<compile_context>
chip_gen: v5e
topology: v5e:2x2
jax: 0.10.0
libtpu: 0.0.40
codegen_flags: <defaults>
</compile_context>

<pallas_src>
import functools
import math

import jax
import jax.numpy as jnp
from jax import lax
from jax.experimental import pallas as pl
from jax.experimental.pallas import tpu as pltpu

_INV_LN10 = 1.0 / math.log(10.0)


def _ceil_div(a, b):
    return -(-a // b)


def _entropy_kernel(x_ref, o_ref, *, hw, t_rows, needs_mask):
    """One (batch, spatial-tile) grid step.

    x_ref: (C, t_rows, 128) logits tile in the input dtype.
    o_ref: (8, 128) f32 per-batch accumulator of sum_c p*ln(p); the same
           output block is resident in VMEM for every j of this batch.
    """
    j = pl.program_id(1)

    @pl.when(j == 0)
    def _init():
        o_ref[...] = jnp.zeros_like(o_ref)

    x = x_ref[...].astype(jnp.float32)                 # (C, S, 128)

    # Numerically-stable softmax statistics over the channel axis. With the
    # channel axis leading, these are elementwise ops across C dense (S, 128)
    # tiles — no cross-lane / cross-sublane (XLU) work in the hot loop.
    m = jnp.max(x, axis=0)                             # (S, 128)
    xm = x - m
    e = jnp.exp(xm)                                    # only per-element transcendental
    s = jnp.sum(e, axis=0)                             # (S, 128)
    t = jnp.sum(e * xm, axis=0)                        # (S, 128)

    # sum_c p*ln(p) = t/s - ln(s).  approx reciprocal keeps the per-position
    # divide on the EUP slot; the 1/ln(10) scale is applied to the final scalar.
    ent = (t - s * jnp.log(s)) * pl.reciprocal(s, approx=True)

    if needs_mask:
        # Drop spatial positions beyond the true extent (wrapper zero-padding
        # and/or OOB rows of a ragged last tile).  A select, not a multiply:
        # garbage stays confined to its own position and is zeroed here.
        row = lax.broadcasted_iota(jnp.int32, (t_rows, 128), 0)
        lane = lax.broadcasted_iota(jnp.int32, (t_rows, 128), 1)
        pos = (j * t_rows + row) * 128 + lane
        ent = jnp.where(pos < hw, ent, 0.0)

    # Fold the (S, 128) partial into one (8, 128) vreg: S/8 elementwise adds.
    o_ref[...] += ent.reshape(t_rows // 8, 8, 128).sum(axis=0)


def entropy(x, *, max_tile_bytes=4 * 1024 * 1024):
    """Pallas equivalent of Entropy.forward: sum(softmax(x, 1) * log10(softmax(x, 1))).

    `max_tile_bytes` budgets the f32-equivalent footprint of one input tile.
    The 4 MiB default is safe on v5e/v6e/v7x; raise to 8-16 MiB on v6e/v7x.
    """
    if x.ndim < 2:
        raise ValueError("Entropy expects at least 2 dims (softmax over axis 1).")
    b, c = int(x.shape[0]), int(x.shape[1])
    hw = int(math.prod(x.shape[2:])) if x.ndim > 2 else 1
    itemsize = jnp.dtype(x.dtype).itemsize

    # Row alignment of the (rows, 128) spatial layout: native minor tile is
    # (8, 128) for 32-bit, (16, 128) for 16-bit, (32, 128) for 8-bit dtypes.
    align = 8 if itemsize >= 4 else (16 if itemsize == 2 else 32)

    # Free reshape (row-major, no permutation), then zero-pad the flattened
    # spatial axis up to a whole number of aligned (align, 128) row groups.
    rows = _ceil_div(hw, 128)
    rows_pad = _ceil_div(rows, align) * align
    hw_pad = rows_pad * 128
    x3 = x.reshape(b, c, hw)
    if hw_pad != hw:
        x3 = jnp.pad(x3, ((0, 0), (0, 0), (0, hw_pad - hw)))
    x4 = x3.reshape(b, c, rows_pad, 128)

    # Spatial tile: a multiple of `align` rows, sized so one tile holds at
    # most ~max_tile_bytes of f32-equivalent data.
    rows_budget = max(align, (max_tile_bytes // (c * 128 * 4)) // align * align)
    t_rows = int(min(rows_pad, rows_budget))
    n_j = _ceil_div(rows_pad, t_rows)
    needs_mask = (n_j * t_rows * 128) != hw

    kernel = functools.partial(
        _entropy_kernel, hw=hw, t_rows=t_rows, needs_mask=needs_mask)

    # VMEM cap: 2 double-buffered input tiles + full-tile f32 elementwise
    # temporaries (cast, xm, e, e*xm, ...) + headroom.  This is only a limit;
    # at the default tile size it stays well under every generation's
    # physical VMEM (64 MiB on v7x, 128 MiB on v5e/v6e).
    in_block_bytes = c * t_rows * 128 * itemsize
    f32_block_bytes = c * t_rows * 128 * 4
    vmem_limit = int(min(96 * 1024 * 1024,
                         2 * in_block_bytes + 6 * f32_block_bytes + (4 << 20)))

    numel = b * c * hw
    cost = pl.CostEstimate(
        flops=6 * numel,
        transcendentals=numel + 2 * b * hw,   # exp per element; log + recip per position
        bytes_accessed=b * c * hw_pad * itemsize + b * 8 * 128 * 4,
    )

    out = pl.pallas_call(
        kernel,
        out_shape=jax.ShapeDtypeStruct((b, 8, 128), jnp.float32),
        grid_spec=pltpu.PrefetchScalarGridSpec(
            num_scalar_prefetch=0,
            grid=(b, n_j),
            in_specs=[pl.BlockSpec((None, c, t_rows, 128),
                                   lambda bi, ji: (bi, 0, ji, 0))],
            out_specs=pl.BlockSpec((None, 8, 128), lambda bi, ji: (bi, 0, 0)),
        ),
        compiler_params=pltpu.CompilerParams(
            dimension_semantics=("parallel", "arbitrary"),
            vmem_limit_bytes=vmem_limit,
        ),
        cost_estimate=cost,
    )(x4)

    # Tiny (B, 8, 128) reduction + log10 scale outside the kernel.
    total = jnp.sum(out) * _INV_LN10
    return total.astype(x.dtype)


def entropy_reference(x):
    p = jax.nn.softmax(x.astype(jnp.float32), axis=1)
    return jnp.sum(p * jnp.log10(p)).astype(x.dtype)


if __name__ == "__main__":
    key = jax.random.PRNGKey(0)

    # Small NCHW-like logits tensor; softmax is over dim=1 (channels).
    x = jax.random.normal(key, (2, 4, 16, 16), dtype=jnp.float32)
    result = entropy(x)
    jax.block_until_ready(result)
    ref = entropy_reference(x)
    assert jnp.allclose(result, ref, rtol=1e-3, atol=1e-3), (result, ref)

    # Ragged spatial extent (HW not a multiple of 128).
    x_ragged = jax.random.normal(jax.random.PRNGKey(1), (2, 4, 7, 9),
                                 dtype=jnp.float32)
    assert jnp.allclose(entropy(x_ragged), entropy_reference(x_ragged),
                        rtol=1e-3, atol=1e-3)

    # 2-D input (no spatial dims at all).
    x_2d = jax.random.normal(jax.random.PRNGKey(2), (4, 6), dtype=jnp.float32)
    assert jnp.allclose(entropy(x_2d), entropy_reference(x_2d),
                        rtol=1e-3, atol=1e-3)

    print("KERNEL_OK")
</pallas_src>

<mosaic_0001>
module attributes {stable_mosaic.version = 11 : i64} {
  func.func @_entropy_kernel(%arg0: i32, %arg1: i32, %arg2: memref<1x4x8x128xf32, #tpu.memory_space<vmem>>, %arg3: memref<1x8x128xf32, #tpu.memory_space<vmem>>) attributes {dimension_semantics = [#tpu.dimension_semantics<parallel>, #tpu.dimension_semantics<arbitrary>], iteration_bounds = array<i64: 2, 1>, scalar_prefetch = 0 : i64, scratch_operands = 0 : i64, tpu.core_type = #tpu.core_type<tc>, window_params = [{transform_indices = @transform_0, window_bounds = array<i64: 1, 4, 8, 128>}, {transform_indices = @transform_1, window_bounds = array<i64: 1, 8, 128>}]} {
    %c0_i32 = arith.constant 0 : i32
    %0 = arith.cmpi eq, %arg1, %c0_i32 : i32
    %1 = arith.extui %0 : i1 to i32
    %c0_i32_0 = arith.constant 0 : i32
    %2 = arith.cmpi ne, %1, %c0_i32_0 : i32
    scf.if %2 {
      %cst_14 = arith.constant 0.000000e+00 : f32
      %38 = vector.broadcast %cst_14 : f32 to vector<8x128xf32>
      %c0_15 = arith.constant 0 : index
      %c0_16 = arith.constant 0 : index
      %c0_17 = arith.constant 0 : index
      %39 = vector.load %arg3[%c0_15, %c0_16, %c0_17] : memref<1x8x128xf32, #tpu.memory_space<vmem>>, vector<1x8x128xf32>
      %40 = vector.shape_cast %39 : vector<1x8x128xf32> to vector<8x128xf32>
      %41 = vector.shape_cast %38 : vector<8x128xf32> to vector<1x8x128xf32>
      tpu.vector_store %arg3[%c0_15, %c0_16, %c0_17], %41 {strides = array<i32>} : memref<1x8x128xf32, #tpu.memory_space<vmem>>, vector<1x8x128xf32>,
    } else {
    }
    %c0 = arith.constant 0 : index
    %c0_1 = arith.constant 0 : index
    %c0_2 = arith.constant 0 : index
    %c0_3 = arith.constant 0 : index
    %3 = vector.load %arg2[%c0, %c0_1, %c0_2, %c0_3] : memref<1x4x8x128xf32, #tpu.memory_space<vmem>>, vector<1x4x8x128xf32>
    %4 = vector.shape_cast %3 : vector<1x4x8x128xf32> to vector<4x8x128xf32>
    %cst = arith.constant dense<0xFF800000> : vector<8x128xf32>
    %5 = vector.multi_reduction <maximumf>, %4, %cst [0] : vector<4x8x128xf32> to vector<8x128xf32>
    %6 = vector.shape_cast %5 : vector<8x128xf32> to vector<1x8x128xf32>
    %7 = vector.broadcast %6 : vector<1x8x128xf32> to vector<4x8x128xf32>
    %8 = arith.subf %4, %7 : vector<4x8x128xf32>
    %9 = math.exp %8 : vector<4x8x128xf32>
    %cst_4 = arith.constant dense<0.000000e+00> : vector<8x128xf32>
    %10 = vector.multi_reduction <add>, %9, %cst_4 [0] : vector<4x8x128xf32> to vector<8x128xf32>
    %11 = arith.mulf %9, %8 : vector<4x8x128xf32>
    %cst_5 = arith.constant dense<0.000000e+00> : vector<8x128xf32>
    %12 = vector.multi_reduction <add>, %11, %cst_5 [0] : vector<4x8x128xf32> to vector<8x128xf32>
    %13 = math.log %10 : vector<8x128xf32>
    %14 = arith.mulf %10, %13 : vector<8x128xf32>
    %15 = arith.subf %12, %14 : vector<8x128xf32>
    %16 = tpu.reciprocal %10 {approx = true} : vector<8x128xf32> -> vector<8x128xf32>
    %17 = arith.mulf %15, %16 : vector<8x128xf32>
    %18 = tpu.iota {dimensions = array<i32: 0>} : vector<8x128xi32>
    %19 = tpu.iota {dimensions = array<i32: 1>} : vector<8x128xi32>
    %c8_i32 = arith.constant 8 : i32
    %20 = arith.muli %arg1, %c8_i32 : i32
    %21 = vector.broadcast %20 : i32 to vector<8x128xi32>
    %22 = arith.addi %21, %18 : vector<8x128xi32>
    %c128_i32 = arith.constant 128 : i32
    %23 = vector.broadcast %c128_i32 : i32 to vector<8x128xi32>
    %24 = arith.muli %22, %23 : vector<8x128xi32>
    %25 = arith.addi %24, %19 : vector<8x128xi32>
    %c256_i32 = arith.constant 256 : i32
    %26 = vector.broadcast %c256_i32 : i32 to vector<8x128xi32>
    %27 = arith.cmpi slt, %25, %26 : vector<8x128xi32>
    %cst_6 = arith.constant 0.000000e+00 : f32
    %28 = vector.broadcast %cst_6 : f32 to vector<8x128xf32>
    %29 = arith.select %27, %17, %28 : vector<8x128xi1>, vector<8x128xf32>
    %c0_7 = arith.constant 0 : index
    %c0_8 = arith.constant 0 : index
    %c0_9 = arith.constant 0 : index
    %30 = vector.load %arg3[%c0_7, %c0_8, %c0_9] : memref<1x8x128xf32, #tpu.memory_space<vmem>>, vector<1x8x128xf32>
    %31 = vector.shape_cast %30 : vector<1x8x128xf32> to vector<8x128xf32>
    %32 = vector.shape_cast %29 : vector<8x128xf32> to vector<1x8x128xf32>
    %cst_10 = arith.constant dense<0.000000e+00> : vector<8x128xf32>
    %33 = vector.multi_reduction <add>, %32, %cst_10 [0] : vector<1x8x128xf32> to vector<8x128xf32>
    %34 = arith.addf %31, %33 : vector<8x128xf32>
    %c0_11 = arith.constant 0 : index
    %c0_12 = arith.constant 0 : index
    %c0_13 = arith.constant 0 : index
    %35 = vector.load %arg3[%c0_11, %c0_12, %c0_13] : memref<1x8x128xf32, #tpu.memory_space<vmem>>, vector<1x8x128xf32>
    %36 = vector.shape_cast %35 : vector<1x8x128xf32> to vector<8x128xf32>
    %37 = vector.shape_cast %34 : vector<8x128xf32> to vector<1x8x128xf32>
    tpu.vector_store %arg3[%c0_11, %c0_12, %c0_13], %37 {strides = array<i32>} : memref<1x8x128xf32, #tpu.memory_space<vmem>>, vector<1x8x128xf32>,
    return
  }
  func.func @transform_0(%arg0: i32, %arg1: i32) -> (i32, i32, i32, i32) {
    %c0_i32 = arith.constant 0 : i32
    %c0_i32_0 = arith.constant 0 : i32
    %c0_i32_1 = arith.constant 0 : i32
    return %arg0, %c0_i32, %arg1, %c0_i32_0 : i32, i32, i32, i32
  }
  func.func @transform_1(%arg0: i32, %arg1: i32) -> (i32, i32, i32) {
    %c0_i32 = arith.constant 0 : i32
    %c0_i32_0 = arith.constant 0 : i32
    %c0_i32_1 = arith.constant 0 : i32
    return %arg0, %c0_i32, %c0_i32_0 : i32, i32, i32
  }
}

</mosaic_0001>

<bundles_post_ra>
// kernel: tpu_custom_call.1
= control target key start
LH: loop header
LB: loop body
LE: loop exit
PB: predicated region body
PF: predicated region fallthrough
CT: control target
= control target key end

     0   :  { %6 = vsyncpa [#allocation3], 0  ;;  %s642_s0 = inlined_call_operand.hbm [shape: f32[2,4,8,128], index: 0, kind: input, shape index: {}]   ;;  %s643_s1 = inlined_call_operand.hbm [shape: f32[2,8,128], index: 1, kind: output, shape index: {}]  }
   0x1   :  { %8 = vsyncpa [#allocation3 + $0x1], 0 }
   0x2   :  { %9 = vsyncpa [#allocation4], 0 }
   0x3   :  { %11 = vsyncpa [#allocation4 + $0x1], 0  ;;  %s521_s6 = smov 0   ;;  %s523_s7 = smov 0  }
   0x4   :  { %s525_s8 = smov 0   ;;  %s527_s9 = smov 0  }
   0x5   :  { %s529_s10 = smov 0   ;;  %s531_s11 = smov 0  }
   0x6 LB: > { %s303_s12 = sadd.s32 4294967295, %s507_s11   ;;  %s304_s13 = sadd.s32 4294967294, %s507_s11   ;;  %s507_s11 = sphi %s531_s11, %s17_s11   ;;  %s503_s10 = sphi %s529_s10, %s652_s10   ;;  %s499_s9 = sphi %s527_s9, %s651_s9   ;;  %s495_s8 = sphi %s525_s8, %s650_s8   ;;  %s491_s7 = sphi %s523_s7, %s649_s7   ;;  %s487_s6 = sphi %s521_s6, %s648_s6  }
   0x7   : > { %s29_s14 = sadd.s32 1, %s503_s10  ;;  %s38_s15 = sadd.s32 1, %s495_s8 }
   0x8   : > { %p31_p0 = scmp.ge.s32.totalorder %s29_s14, 2  ;;  %p45_p1 = scmp.ne.s32.totalorder %s495_s8, %s491_s7 }
   0x9   : > { %p46_p2 = scmp.eq.s32.totalorder %s507_s11, 0  ;;  %p51_p3 = scmp.ne.s32.totalorder %s491_s7, %s487_s6 }
   0xa   : > { %s654_s14 = smov (%p31_p0, %s29_s14), 0  ;;  %p52_p5 = scmp.eq.s32.totalorder %s303_s12, 0 }
   0xb   : > { %p562_p4 = por %p46_p2, %p45_p1  ;;  %s33_s17 = ssub.s32 %s503_s10, %s654_s14 }
   0xc   : > { %p75_p6 = scmp.eq.s32.totalorder %s303_s12, 1  ;;  %p36_p7 = scmp.eq.s32.totalorder %s33_s17, 0 }
   0xd   : > { %p568_p8 = por %p52_p5, %p51_p3  ;;  %p81_p10 = scmp.eq.s32.totalorder %s304_s13, 1 }
   0xe   : > { %p572_p9 = por %p75_p6, %p45_p1  ;;  %p306_p12 = scmp.ge.s32.totalorder %s507_s11, 2 }
   0xf   : > { %s577_s20 = scalar_select %p36_p7, %s495_s8, %s38_s15  }
  0x10   : > { %p579_p11 = por %p81_p10, %p51_p3  ;;  %p330_p13 = scmp.lt.s32.totalorder %s507_s11, 2 }
  0x11   : > { %s101_s22 = sand.u32 1, %s495_s8   ;;  %s317_s24 = sshll.u32 %s503_s10, 5 }
  0x12   : > { %s307_s23 = sshll.u32 %s101_s22, 5  ;;  %s111_s27 = scalar_lea.hbm %s642_s0, %s317_s24 }
  0x13   : > { %s105_s28 = scalar_lea.vmem [#allocation2], %s307_s23  ;;  %s112_s30 = sshll.u32 %s111_s27, 4  ;;  %s113_s30 = int_to_ptr.hbm [resolvable:$true] %s112_s30 }
  0x14   : > { %s114_s29 = sshll.u32 %s105_s28, 4  ;;  %p323_p0 = pnand %p330_p13, %p562_p4  ;;  %s115_s29 = int_to_ptr.vmem [resolvable:$true] %s114_s29 }
  0x15   : > { %p310_p1 = scmp.ge.s32.totalorder %s507_s11, 1  ;;  %s102_s2 = scalar_lea.sflag [#allocation3], %s101_s22 }
  0x16   : > { %s509_s3 = smov 128   ;;  %s510_s4 = smov 8  }
  0x17   : > { %325 = dma.hbm_to_vmem [thread:$0]  (!%p323_p0), %s113_s30, 512, %s115_s29, %s102_s2, %s509_s3, %s509_s3, %s510_s4  }
  0x18   : > { %p122_p2 = scmp.lt.s32.totalorder %s507_s11, 3 }
  0x1a   : > { %p123_p3 = pnand %p310_p1, %p122_p2 }
  0x1b   : > { %s595_s5 = sand.u32 (!%p123_p3), 1, %s491_s7  }
  0x1c   : > { %126 = sbr.rel (%p123_p3) target bundleno = 77 (0x4d), region = 24  ;;  %s311_s12 = sshll.u32 (!%p123_p3), %s595_s5, 5 }
  0x1d   : > { %s129_s13 = scalar_lea.sflag (!%p123_p3), [#allocation3], %s595_s5  ;;  %s132_s15 = scalar_lea.vmem (!%p123_p3), [#allocation2], %s311_s12 }
  0x21   : > { %478 = dma.done.wait (%p568_p8), %s129_s13, 512  }
  0x22   : > { %480 = vsyncadd (%p568_p8), %s129_s13, 4294966784  ;;  %v157_v0 = vld [vmem:[%s132_s15] sm:$0xff]  ;;  %v158_v1 = vld [vmem:[%s132_s15 + $0x8] sm:$0xff]  ;;  %v192_v23 = vlaneseq  ;;  %s312_s16 = sshll.u32 %s595_s5, 3  ;;  %s314_s17 = sshll.u32 %s499_s9, 3 }
  0x23   : > { %v159_v2 = vld [vmem:[%s132_s15 + $0x10] sm:$0xff]  ;;  %v160_v3 = vld [vmem:[%s132_s15 + $0x18] sm:$0xff]  ;;  %v161_v4 = vmax.f32 %v157_v0, %v158_v1  ;;  %s218_s23 = scalar_lea.hbm %s643_s1, %s314_s17  ;;  %s151_s24 = scalar_lea.vmem [#allocation5], %s312_s16 }
  0x24   : > { %v162_v5 = vmax.f32 %v159_v2, %v160_v3  ;;  %v193_v27 = vshrl.u32 %v192_v23, 7  ;;  %v195_v30 = vand.u32 127, %v192_v23  ;;  %s220_s25 = sshll.u32 %s151_s24, 4  ;;  %s222_s26 = sshll.u32 %s218_s23, 4  ;;  %s221_s25 = int_to_ptr.vmem [resolvable:$true] %s220_s25  ;;  %s223_s26 = int_to_ptr.hbm [resolvable:$true] %s222_s26 }
  0x25   : > { %s208_s27 = scalar_lea.sflag [#allocation4], %s595_s5  ;;  %s439_s9 = sshra.s32 %s223_s26, 4  ;;  %s440_s9 = int_to_ptr.hbm [resolvable:$true] %s439_s9 }
  0x26   : > { %v163_v6 = vmax.f32 %v161_v4, %v162_v5  ;;  %v199_v31 = vmul.u32 128, %v193_v27  ;;  %s441_s28 = scalar_lea.hbm %s440_s9, 8  ;;  %s445_s2 = scalar_lea.hbm %s643_s1, 16 }
  0x27   : > { %p442_p4 = scmp.ne.s32.totalorder %s440_s9, %s441_s28  ;;  %p446_p7 = scmp.lt.s32.totalorder %s440_s9, %s643_s1 }
  0x28   : > { %v164_v7 = vsub.f32 %v157_v0, %v163_v6  ;;  %v165_v8 = vsub.f32 %v158_v1, %v163_v6  ;;  %v166_v9 = vsub.f32 %v159_v2, %v163_v6  ;;  %v167_v10 = vsub.f32 %v160_v3, %v163_v6  ;;  %p447_p8 = scmp.lt.s32.totalorder %s445_s2, %s441_s28 }
  0x29   : > { %v200_v35 = vadd.s32 %v199_v31, %v195_v30  ;;  %p443_p5 = pnand %p442_p4, %p572_p9 }
  0x2a   : > { %v168_v11 = vmul.f32 1.442695, %v164_v7  ;;  %v170_v12 = vmul.f32 1.442695, %v165_v8  ;;  %v172_v13 = vmul.f32 1.442695, %v166_v9  ;;  %p448_p10 = por %p447_p8, %p446_p7 }
  0x2b   : > { %v174_v14 = vmul.f32 1.442695, %v167_v10  ;;  %vm201_vm0 = vcmp.lt.s32.totalorder %v200_v35, 256  ;;  %p444_p6 = pneg %p443_p5 }
  0x2c   : > { %383 = vpow2.f32 %v168_v11 }
  0x2d   : > { %385 = vpow2.f32 %v170_v12  ;;  %p449_p13 = pnand %p448_p10, %p444_p6 }
  0x2e   : > { %387 = vpow2.f32 %v172_v13 }
  0x2f   : > { %389 = vpow2.f32 %v174_v14 }
  0x32   : > { %v384_v15 = vpop.eup %383 }
  0x33   : > { %v386_v16 = vpop.eup %385  ;;  %v179_v20 = vmul.f32 %v384_v15, %v164_v7 }
  0x34   : > { %v388_v17 = vpop.eup %387  ;;  %v176_v18 = vadd.f32 %v386_v16, %v384_v15  ;;  %v180_v21 = vmul.f32 %v386_v16, %v165_v8 }
  0x35   : > { %v390_v19 = vpop.eup %389  ;;  %v181_v25 = vmul.f32 %v388_v17, %v166_v9 }
  0x36   : > { %v177_v22 = vadd.f32 %v388_v17, %v176_v18  ;;  %v183_v26 = vadd.f32 %v180_v21, %v179_v20  ;;  %v182_v28 = vmul.f32 %v390_v19, %v167_v10 }
  0x38   : > { %v178_v24 = vadd.f32 %v390_v19, %v177_v22  ;;  %v184_v29 = vadd.f32 %v183_v26, %v181_v25 }
  0x3a   : > { %391 = vlog2.f32 %v178_v24  ;;  %v185_v33 = vadd.f32 %v184_v29, %v182_v28 }
  0x3b   : > { %393 = vrcp.f32 %v178_v24 }
  0x40   : > { %v392_v32 = vpop.eup %391 }
  0x41   : > { %v187_v34 = vmul.f32 0.6931472, %v392_v32  ;;  %v394_v37 = vpop.eup %393 }
  0x43   : > { %v188_v36 = vmul.f32 %v187_v34, %v178_v24 }
  0x45   : > { %v189_v38 = vsub.f32 %v185_v33, %v188_v36 }
  0x47   : > { %v191_v39 = vmul.f32 %v394_v37, %v189_v38 }
  0x49   : > { %v202_v40 = vsel %vm201_vm0, %v191_v39, 0.0 }
  0x4a   : > { %206 = vst [vmem:[%s151_s24] sm:$0xff] %v202_v40 }
  0x4b   : > { %452 = shalt.err (!%p449_p13)
}
  0x4c   : > { %320 = dma.vmem_to_hbm [thread:$0]  (%p572_p9), %s221_s25, 128, %s223_s26, %s208_s27  }
  0x4d PF: > { %s234_s5 = sand.u32 1, %s487_s6   ;;  %p327_p0 = pnand %p306_p12, %p579_p11 }
  0x4e   : > { %s235_s12 = scalar_lea.sflag [#allocation4], %s234_s5 }
  0x4f   : > { %p328_p1 = pneg %p327_p0 }
  0x51   : > { %482 = dma.done.wait (%p328_p1), %s235_s12, 128  }
  0x52   : > { %484 = vsyncadd (%p328_p1), %s235_s12, 4294967168  ;;  %s17_s11 = sadd.s32 1, %s507_s11   ;;  %s648_s6 = smov %s491_s7 }
  0x53   : > { %p14_p2 = scmp.ge.s32.totalorder %s17_s11, 4   ;;  %s649_s7 = smov %s495_s8 }
  0x54   : > { %s650_s8 = smov %s577_s20  ;;  %s651_s9 = smov %s503_s10 }
  0x55   : > { %s652_s10 = smov %s654_s14  ;;  %16 = sbr.rel (!%p14_p2) target bundleno = 6 (0x6), region = 73 }
  0x5a   :  { %241 = vsyncpa [#allocation3], 1 }
  0x5b   :  { %243 = vsyncpa [#allocation3 + $0x1], 1 }
  0x5c   :  { %244 = vsyncpa [#allocation4], 1 }
  0x5d   :  { %246 = vsyncpa [#allocation4 + $0x1], 1 }

</bundles_post_ra>
